<compile_context>
chip_gen: v7x
topology: tpu7x:2x2x1
jax: 0.10.0
libtpu: 0.0.40
codegen_flags: <defaults>
</compile_context>

<pallas_src>
import functools

import jax
import jax.numpy as jnp
from jax.experimental import pallas as pl
from jax.experimental.pallas import tpu as pltpu


def _round_up(x, m):
    return ((x + m - 1) // m) * m


def conv2d_kernel(x_ref, w_ref, b_ref, o_ref, *, kh, kw, wp, sv_pad, nb):
    """One (possibly batch-folded) block per grid step.

    x_ref: (nb, Cin, Sp)     padded input, spatial flattened onto lanes
    w_ref: (Cout, K)         K = KH*KW*Cin, tap-major then channel
    b_ref: (Cout, 1)
    o_ref: (nb, Cout, Svp)   conv output over flattened padded-grid positions
    """
    # Build the im2col slab as a value (kept in vregs; ~15 vregs at the
    # reference shapes) -- no scratch store/reload pass.
    slabs = []
    for bb in range(nb):
        x = x_ref[bb]                                   # (Cin, Sp)
        pieces = []
        for i in range(kh):
            for j in range(kw):
                s = i * wp + j                          # static lane shift
                pieces.append(x[:, s:s + sv_pad])       # (Cin, Svp)
        slabs.append(jnp.concatenate(pieces, axis=0))   # (K, Svp)
    patches = slabs[0] if nb == 1 else jnp.concatenate(slabs, axis=1)

    # Single lane-dense MXU contraction over K = Cin*KH*KW, all nb elements.
    acc = jnp.dot(w_ref[...], patches,
                  preferred_element_type=jnp.float32)   # (Cout, nb*Svp)
    acc = acc + b_ref[...].astype(jnp.float32)          # fused bias

    for bb in range(nb):                                # 128-aligned lane slices
        o_ref[bb] = acc[:, bb * sv_pad:(bb + 1) * sv_pad].astype(o_ref.dtype)


def trans_layer_rule3_conv2d(x_nchw, weight_oihw, bias,
                             *, stride=1, padding=1, dilation=1):
    """Forward pass of TransLayer_rule3_Conv2d.

    x_nchw:      (N, Cin, H, W)
    weight_oihw: (Cout, Cin, KH, KW)   -- torch Conv2d weight convention
    bias:        (Cout,)
    returns:     (N, Cout, Hout, Wout)
    """
    if stride != 1 or dilation != 1:
        raise NotImplementedError("kernel assumes stride=1, dilation=1")

    n, cin, h, w = x_nchw.shape
    cout, cin_w, kh, kw = weight_oihw.shape
    assert cin_w == cin, (cin_w, cin)

    hp, wp = h + 2 * padding, w + 2 * padding
    h_out = hp - kh + 1
    w_out = wp - kw + 1
    s_full = hp * wp
    k_dim = kh * kw * cin

    # Lane-dense output width: must cover every valid flattened position
    # p = h*Wp + w (max p = Hout*Wp - KW) and be >= Hout*Wp so the wrapper can
    # reshape a slice directly (no output pad pass); round to a 128 multiple.
    sv_pad = _round_up(h_out * wp, 128)
    # Input lane width: big enough for the deepest shifted slice, 128-aligned.
    max_shift = (kh - 1) * wp + (kw - 1)
    s_pad = _round_up(max(s_full, max_shift + sv_pad), 128)

    # Batch folding: amortize per-grid-step overhead for larger N while
    # keeping >= 2 grid steps so both v7x TensorCores get work.
    if n <= 2 or n % 2 != 0:
        nb = 1
    else:
        nb = n // 2
    assert n % nb == 0
    n_steps = n // nb

    # Wrapper-side layout plumbing: spatial zero-pad, flatten spatial onto the
    # lane axis, pad lanes to s_pad; weight flattened to (Cout, K) with
    # K-order (i*KW + j)*Cin + c matching the in-kernel slab layout.
    x_pad = jnp.pad(
        x_nchw, ((0, 0), (0, 0), (padding, padding), (padding, padding)))
    x_flat = x_pad.reshape(n, cin, s_full)
    x_flat = jnp.pad(x_flat, ((0, 0), (0, 0), (0, s_pad - s_full)))
    w2d = jnp.transpose(weight_oihw, (0, 2, 3, 1)).reshape(cout, k_dim)
    b2d = bias.reshape(cout, 1)

    kernel = functools.partial(
        conv2d_kernel, kh=kh, kw=kw, wp=wp, sv_pad=sv_pad, nb=nb)

    out_flat = pl.pallas_call(
        kernel,
        out_shape=jax.ShapeDtypeStruct((n, cout, sv_pad), x_nchw.dtype),
        grid=(n_steps,),
        in_specs=[
            pl.BlockSpec((nb, cin, s_pad), lambda b: (b, 0, 0)),
            pl.BlockSpec((cout, k_dim), lambda b: (0, 0)),   # resident weight
            pl.BlockSpec((cout, 1), lambda b: (0, 0)),       # resident bias
        ],
        out_specs=pl.BlockSpec((nb, cout, sv_pad), lambda b: (b, 0, 0)),
        compiler_params=pltpu.CompilerParams(
            dimension_semantics=("parallel",)),
    )(x_flat, w2d, b2d)

    # Un-flatten: position p = h*Wp + w; drop the wrap-around columns.
    out = out_flat[:, :, :h_out * wp].reshape(n, cout, h_out, wp)
    out = out[:, :, :, :w_out]
    return out


if __name__ == "__main__":
    # Small shapes consistent with Conv2d(4 -> 8, kernel 3x3, stride 1, pad 1).
    N, CIN, H, W = 2, 4, 16, 16
    COUT, KH, KW = 8, 3, 3
    PAD = 1

    key = jax.random.PRNGKey(0)
    kx, kw_, kb = jax.random.split(key, 3)

    x = jax.random.normal(kx, (N, CIN, H, W), dtype=jnp.float32)
    weight = jax.random.normal(kw_, (COUT, CIN, KH, KW), dtype=jnp.float32) * 0.1
    bias = jax.random.normal(kb, (COUT,), dtype=jnp.float32) * 0.1

    out = trans_layer_rule3_conv2d(x, weight, bias, padding=PAD)
    out = jax.block_until_ready(out)

    # Reference check against XLA's conv (same semantics as torch Conv2d /
    # the module's unsqueeze->Conv3d->squeeze round-trip).
    ref = jax.lax.conv_general_dilated(
        x, weight,
        window_strides=(1, 1),
        padding=((PAD, PAD), (PAD, PAD)),
        dimension_numbers=("NCHW", "OIHW", "NCHW"),
    ) + bias.reshape(1, COUT, 1, 1)

    assert out.shape == (N, COUT, H, W), out.shape
    assert jnp.allclose(out, ref, atol=1e-4, rtol=1e-4), "mismatch vs reference"

    print("KERNEL_OK")
</pallas_src>

<mosaic_0001>
module attributes {stable_mosaic.version = 11 : i64} {
  func.func @conv2d_kernel(%arg0: i32, %arg1: memref<1x4x512xf32, #tpu.memory_space<vmem>>, %arg2: memref<8x36xf32, #tpu.memory_space<vmem>>, %arg3: memref<8x1xf32, #tpu.memory_space<vmem>>, %arg4: memref<1x8x384xf32, #tpu.memory_space<vmem>>) attributes {dimension_semantics = [#tpu.dimension_semantics<parallel>], iteration_bounds = array<i64: 2>, scalar_prefetch = 0 : i64, scratch_operands = 0 : i64, tpu.core_type = #tpu.core_type<tc>, window_params = [{transform_indices = @transform_0, window_bounds = array<i64: 1, 4, 512>}, {pipeline_mode = #tpu.pipeline_mode<synchronous>, transform_indices = @transform_1, window_bounds = array<i64: 8, 36>}, {pipeline_mode = #tpu.pipeline_mode<synchronous>, transform_indices = @transform_2, window_bounds = array<i64: 8, 1>}, {transform_indices = @transform_3, window_bounds = array<i64: 1, 8, 384>}]} {
    %c0 = arith.constant 0 : index
    %c0_0 = arith.constant 0 : index
    %c0_1 = arith.constant 0 : index
    %0 = vector.load %arg1[%c0, %c0_0, %c0_1] : memref<1x4x512xf32, #tpu.memory_space<vmem>>, vector<1x4x512xf32>
    %1 = vector.shape_cast %0 : vector<1x4x512xf32> to vector<4x512xf32>
    %2 = vector.extract_strided_slice %1 {offsets = [0, 0], sizes = [4, 384], strides = [1, 1]} : vector<4x512xf32> to vector<4x384xf32>
    %3 = vector.extract_strided_slice %1 {offsets = [0, 1], sizes = [4, 384], strides = [1, 1]} : vector<4x512xf32> to vector<4x384xf32>
    %4 = vector.extract_strided_slice %1 {offsets = [0, 2], sizes = [4, 384], strides = [1, 1]} : vector<4x512xf32> to vector<4x384xf32>
    %5 = vector.extract_strided_slice %1 {offsets = [0, 18], sizes = [4, 384], strides = [1, 1]} : vector<4x512xf32> to vector<4x384xf32>
    %6 = vector.extract_strided_slice %1 {offsets = [0, 19], sizes = [4, 384], strides = [1, 1]} : vector<4x512xf32> to vector<4x384xf32>
    %7 = vector.extract_strided_slice %1 {offsets = [0, 20], sizes = [4, 384], strides = [1, 1]} : vector<4x512xf32> to vector<4x384xf32>
    %8 = vector.extract_strided_slice %1 {offsets = [0, 36], sizes = [4, 384], strides = [1, 1]} : vector<4x512xf32> to vector<4x384xf32>
    %9 = vector.extract_strided_slice %1 {offsets = [0, 37], sizes = [4, 384], strides = [1, 1]} : vector<4x512xf32> to vector<4x384xf32>
    %10 = vector.extract_strided_slice %1 {offsets = [0, 38], sizes = [4, 384], strides = [1, 1]} : vector<4x512xf32> to vector<4x384xf32>
    %11 = tpu.concatenate %2, %3, %4, %5, %6, %7, %8, %9, %10 in 0 : vector<4x384xf32>, vector<4x384xf32>, vector<4x384xf32>, vector<4x384xf32>, vector<4x384xf32>, vector<4x384xf32>, vector<4x384xf32>, vector<4x384xf32>, vector<4x384xf32> -> vector<36x384xf32>
    %c0_2 = arith.constant 0 : index
    %c0_3 = arith.constant 0 : index
    %12 = vector.load %arg2[%c0_2, %c0_3] : memref<8x36xf32, #tpu.memory_space<vmem>>, vector<8x36xf32>
    %cst = arith.constant dense<0.000000e+00> : vector<8x384xf32>
    %13 = tpu.matmul %12, %11, %cst {dimension_numbers = #tpu.dot_dimension_numbers<[1], [0], [0], [1], [0, 0, 1, 1], [], []>} : vector<8x36xf32>, vector<36x384xf32>, vector<8x384xf32> -> vector<8x384xf32>
    %c0_4 = arith.constant 0 : index
    %c0_5 = arith.constant 0 : index
    %14 = vector.load %arg3[%c0_4, %c0_5] : memref<8x1xf32, #tpu.memory_space<vmem>>, vector<8x1xf32>
    %15 = vector.broadcast %14 : vector<8x1xf32> to vector<8x384xf32>
    %16 = arith.addf %13, %15 : vector<8x384xf32>
    %c0_6 = arith.constant 0 : index
    %c0_7 = arith.constant 0 : index
    %c0_8 = arith.constant 0 : index
    %17 = vector.load %arg4[%c0_6, %c0_7, %c0_8] : memref<1x8x384xf32, #tpu.memory_space<vmem>>, vector<1x8x384xf32>
    %18 = vector.shape_cast %17 : vector<1x8x384xf32> to vector<8x384xf32>
    %19 = vector.shape_cast %16 : vector<8x384xf32> to vector<1x8x384xf32>
    tpu.vector_store %arg4[%c0_6, %c0_7, %c0_8], %19 {strides = array<i32>} : memref<1x8x384xf32, #tpu.memory_space<vmem>>, vector<1x8x384xf32>,
    return
  }
  func.func @transform_0(%arg0: i32) -> (i32, i32, i32) {
    %c0_i32 = arith.constant 0 : i32
    %c0_i32_0 = arith.constant 0 : i32
    %c0_i32_1 = arith.constant 0 : i32
    return %arg0, %c0_i32, %c0_i32_0 : i32, i32, i32
  }
  func.func @transform_1(%arg0: i32) -> (i32, i32) {
    %c0_i32 = arith.constant 0 : i32
    %c0_i32_0 = arith.constant 0 : i32
    %c0_i32_1 = arith.constant 0 : i32
    return %c0_i32, %c0_i32_0 : i32, i32
  }
  func.func @transform_2(%arg0: i32) -> (i32, i32) {
    %c0_i32 = arith.constant 0 : i32
    %c0_i32_0 = arith.constant 0 : i32
    %c0_i32_1 = arith.constant 0 : i32
    return %c0_i32, %c0_i32_0 : i32, i32
  }
  func.func @transform_3(%arg0: i32) -> (i32, i32, i32) {
    %c0_i32 = arith.constant 0 : i32
    %c0_i32_0 = arith.constant 0 : i32
    %c0_i32_1 = arith.constant 0 : i32
    return %arg0, %c0_i32, %c0_i32_0 : i32, i32, i32
  }
}

</mosaic_0001>

<bundles_post_ra>
// kernel: tpu_custom_call.1
= control target key start
LH: loop header
LB: loop body
LE: loop exit
PB: predicated region body
PF: predicated region fallthrough
CT: control target
= control target key end

     0   :  { %8 = vsyncpa [#allocation3], 0  ;;  %s1126_s0 = inlined_call_operand.hbm [shape: f32[2,4,512], index: 0, kind: input, shape index: {}]   ;;  %s1127_s1 = inlined_call_operand.vmem [shape: f32[8,36], index: 1, kind: input, shape index: {}]   ;;  %s1128_s2 = inlined_call_operand.vmem [shape: f32[8,1], index: 2, kind: input, shape index: {}]   ;;  %s1129_s3 = inlined_call_operand.hbm [shape: f32[2,8,384], index: 3, kind: output, shape index: {}]  }
   0x1   :  { %10 = vsyncpa [#allocation3 + $0x1], 0 }
   0x2   :  { %11 = vsyncpa [#allocation4], 0 }
   0x3   :  { %13 = vsyncpa [#allocation4 + $0x1], 0  ;;  %s889_s12 = smov 0   ;;  %s891_s13 = smov 0  }
   0x4   :  { %s893_s14 = smov 0   ;;  %s895_s15 = smov 0  }
   0x5 LB: > { %s910_s16 = sadd.s32 4294967295, %s853_s15   ;;  %s572_s17 = sadd.s32 4294967294, %s853_s15   ;;  %s853_s15 = sphi %s895_s15, %s1144_s15   ;;  %s849_s14 = sphi %s893_s14, %s1143_s14   ;;  %s845_s13 = sphi %s891_s13, %s1142_s13   ;;  %s841_s12 = sphi %s889_s12, %s1141_s12  }
   0x6   : > { %s914_s18 = sadd.s32 1, %s853_s15   ;;  %s26_s19 = sadd.s32 1, %s849_s14 }
   0x7   : > { %s23_s20 = ssub.s32 %s853_s15, %s914_s18  ;;  %p33_p0 = scmp.ne.s32.totalorder %s849_s14, %s845_s13 }
   0x8   : > { %p24_p1 = scmp.eq.s32.totalorder %s23_s20, 0  ;;  %p34_p2 = scmp.eq.s32.totalorder %s853_s15, 0 }
   0x9   : > { %p39_p3 = scmp.ne.s32.totalorder %s845_s13, %s841_s12  ;;  %p40_p4 = scmp.eq.s32.totalorder %s910_s16, 0 }
   0xa   : > { %s926_s21 = scalar_select %p24_p1, %s849_s14, %s26_s19  }
   0xb   : > { %p928_p5 = por %p34_p2, %p33_p0  ;;  %p932_p6 = por %p40_p4, %p39_p3 }
   0xc   : > { %p105_p7 = scmp.eq.s32.totalorder %s910_s16, 1  ;;  %p111_p8 = scmp.eq.s32.totalorder %s572_s17, 1 }
   0xd   : > { %p636_p10 = scmp.lt.s32.totalorder %s853_s15, 2  ;;  %s137_s26 = sand.u32 1, %s849_s14  }
   0xe   : > { %p939_p11 = por %p105_p7, %p33_p0  ;;  %p943_p12 = por %p111_p8, %p39_p3 }
   0xf   : > { %s588_s27 = sshll.u32 %s853_s15, 8  ;;  %s575_s28 = sshll.u32 %s137_s26, 4 }
  0x10   : > { %s1133_s24 = scalar_select %p939_p11, 1, 0 }
  0x11   : > { %s1134_s25 = scalar_select %p943_p12, 1, 0 }
  0x12   : > { %s952_s4 = scalar_lea.hbm %s1126_s0, %s588_s27  ;;  %s141_s5 = scalar_lea.vmem [#allocation2], %s575_s28 }
  0x13   : > { %s149_s6 = sshll.u32 %s141_s5, 4  ;;  %p956_p13 = pnand %p636_p10, %p928_p5  ;;  %s960_s6 = int_to_ptr.vmem [resolvable:$true] %s149_s6 }
  0x14   : > { %s138_s8 = scalar_lea.sflag [#allocation3], %s137_s26  ;;  %s757_s9 = scalar_lea.hbm %s952_s4, 256 }
  0x15   : > { %p758_p2 = scmp.ne.s32.totalorder %s952_s4, %s757_s9  ;;  %p759_p3 = pneg %p956_p13 }
  0x16   : > { %s762_s17 = scalar_lea.hbm %s1126_s0, 512  ;;  %p763_p5 = scmp.lt.u32.totalorder %s952_s4, %s1126_s0 }
  0x17   : > { %p760_p4 = pnand %p759_p3, %p758_p2  ;;  %p764_p8 = scmp.lt.u32.totalorder %s762_s17, %s757_s9 }
  0x18   : > { %p766_p9 = scmp.lt.u32.totalorder %s757_s9, %s952_s4 }
  0x19   : > { %p761_p7 = pneg %p760_p4  ;;  %p765_p10 = por %p764_p8, %p763_p5 }
  0x1b   : > { %p767_p0 = por %p766_p9, %p765_p10 }
  0x1d   : > { %p768_p1 = pnand %p767_p0, %p761_p7 }
  0x1f   : > { %771 = shalt.err (!%p768_p1)
}
  0x20   : > { %s772_s22 = scalar_lea.vmem %s960_s6, 256  ;;  %s855_s26 = smov [#allocation2]  }
  0x21   : > { %p773_p2 = scmp.ne.s32.totalorder %s960_s6, %s772_s22  ;;  %s777_s27 = sshll.u32 %s855_s26, 4  ;;  %s778_s27 = int_to_ptr.vmem [resolvable:$false] %s777_s27 }
  0x22   : > { %s779_s28 = scalar_lea.vmem %s778_s27, 512  ;;  %p780_p11 = scmp.lt.s32.totalorder %s960_s6, %s778_s27 }
  0x23   : > { %p775_p4 = pnand %p773_p2, %p759_p3  ;;  %p781_p5 = scmp.lt.s32.totalorder %s779_s28, %s772_s22 }
  0x25   : > { %p776_p12 = pneg %p775_p4  ;;  %p782_p8 = por %p781_p5, %p780_p11 }
  0x27   : > { %p783_p9 = pnand %p782_p8, %p776_p12 }
  0x29   : > { %786 = shalt.err (!%p783_p9)
}
  0x2a   : > { %631 = dma.hbm_to_vmem [thread:$0]  (!%p956_p13), %s952_s4, 256, %s960_s6, %s138_s8  }
  0x2b   : > { %p1136_p0 = scmp.lt.s32.totalorder %s853_s15, 3  ;;  %p1137_p1 = scmp.ge.s32.totalorder %s853_s15, 1 }
  0x2d   : > { %p155_p3 = pnand %p1137_p1, %p1136_p0 }
  0x2e   : > { %s994_s29 = sand.u32 (!%p155_p3), 1, %s845_s13  }
  0x2f   : > { %158 = sbr.rel (%p155_p3) target bundleno = 439 (0x1b7), region = 32  ;;  %s579_s30 = sshll.u32 (!%p155_p3), %s994_s29, 4 }
  0x30   : > { %s161_s5 = scalar_lea.sflag (!%p155_p3), [#allocation3], %s994_s29  ;;  %s164_s9 = scalar_lea.vmem (!%p155_p3), [#allocation2], %s579_s30 }
  0x36   : > { %832 = dma.done.wait (%p932_p6), %s161_s5, 256  }
  0x37   : > { %834 = vsyncadd (%p932_p6), %s161_s5, 4294967040  ;;  %v1002_v0 = vld [vmem:[%s164_s9] sm:$0xff]  ;;  %v1004_v1 = vld [vmem:[%s164_s9 + $0x8] sm:$0xff]  ;;  %s856_s4 = smov 110   ;;  %s857_s23 = smov 127   ;;  %v858_v9 = vmov 0.0|0.0  }
  0x38   : > { %v194_v2 = vcombine.low %v1004_v1, %v1004_v1  ;;  %v193_v3 = vcombine.low %v1002_v0, %v1002_v0  ;;  %v1012_v4 = vcombine.high %v1002_v0, %v1002_v0  ;;  %v210_v8 = vcombine.high %v1004_v1, %v1004_v1  ;;  %616 = vmatprep.subr.bf16.mxu1 %v858_v9  ;;  %s859_s6 = smov 126   ;;  %s860_s7 = smov 108   ;;  %v327_v13 = vld [vmem:[%s1128_s2] sm:$0xff] }
  0x39   : > { %s861_s8 = smov 109   ;;  %s862_s10 = smov 91   ;;  %v864_v11 = vmov 0.0   ;;  %vm865_vm0 = vmmov 0   ;;  %v866_v12 = vmov 0   ;;  %vm203_vm1 = vcmask 1039360  }
  0x3a   : > { %v692_v5 = vpack.i.bf16 %v194_v2, %v1002_v0  ;;  %v697_v6 = vpack.i.bf16 %v1004_v1, %v193_v3  ;;  %v687_v7 = vpack.i.bf16 %v1004_v1, %v1012_v4  ;;  %v702_v10 = vpack.i.bf16 %v210_v8, %v1002_v0  ;;  %s863_s11 = smov 92   ;;  %407 = vmatprep.mubr.f32.mxu0 %v864_v11  ;;  %s867_s17 = smov 90  }
  0x3b   : > { %605 = vmatprep.mubr.msk.f32.mxu1 %vm865_vm0, %v864_v11  ;;  %752 = vset.pattern.permute.xlu0 %v866_v12  ;;  %vm219_vm2 = vcmask 1031168   ;;  %vm234_vm3 = vcmask 900096   ;;  %vm313_vm4 = vcmask 1043456   ;;  %vm264_vm5 = vcmask 883712   ;;  %s622_s27 = smul.u32 24, %s994_s29  ;;  %p1138_p11 = scmp.ne.s32.totalorder %s1133_s24, 0 }
  0x3c   : > { %693 = vrot.lane.b32.xlu1 %v692_v5, %s856_s4  ;;  %683 = vrot.lane.b32.xlu0 %v692_v5, %s857_s23  ;;  %vm249_vm6 = vcmask 891904   ;;  %vm294_vm7 = vcmask 744448   ;;  %vm279_vm8 = vcmask 752640   ;;  %vm309_vm9 = vcmask 736256   ;;  %s623_s28 = smul.u32 384, %s910_s16  ;;  %s488_s16 = scalar_lea.sflag [#allocation4], %s994_s29 }
  0x3d   : > { %vm333_vm10 = vcmask 293888   ;;  %s186_s30 = scalar_lea.vmem [#allocation5], %s622_s27 }
  0x3e   : > { %s502_s5 = sshll.u32 %s186_s30, 4  ;;  %s1084_s5 = int_to_ptr.vmem [resolvable:$true] %s502_s5 }
  0x40   : > { %698 = vrot.lane.b32.xlu1 %v697_v6, %s857_s23  ;;  %688 = vrot.lane.b32.xlu0 %v687_v7, %s859_s6  ;;  %s1082_s23 = scalar_lea.hbm %s1129_s3, %s623_s28 }
  0x44   : > { %708 = vrot.lane.b32.xlu1 %v697_v6, %s856_s4  ;;  %703 = vrot.lane.b32.xlu0 %v702_v10, %s859_s6  ;;  %s787_s6 = scalar_lea.vmem %s1084_s5, 384 }
  0x45   : > { %p788_p6 = scmp.ne.s32.totalorder %s1084_s5, %s787_s6 }
  0x47   : > { %p789_p12 = pnand %p788_p6, %p1138_p11 }
  0x48   : > { %718 = vrot.lane.b32.xlu1 %v692_v5, %s860_s7  ;;  %713 = vrot.lane.b32.xlu0 %v687_v7, %s861_s8 }
  0x49   : > { %p790_p13 = pneg %p789_p12 }
  0x4c   : > { %728 = vrot.lane.b32.xlu1 %v692_v5, %s862_s10  ;;  %723 = vrot.lane.b32.xlu0 %v687_v7, %s863_s11 }
  0x50   : > { %738 = vrot.lane.b32.xlu1 %v697_v6, %s860_s7  ;;  %733 = vrot.lane.b32.xlu0 %v702_v10, %s861_s8  ;;  %s868_s7 = smov [#allocation5]  }
  0x51   : > { %s791_s8 = sshll.u32 %s868_s7, 4  ;;  %s792_s8 = int_to_ptr.vmem [resolvable:$false] %s791_s8 }
  0x52   : > { %p794_p7 = scmp.lt.s32.totalorder %s1084_s5, %s792_s8 }
  0x54   : > { %748 = vrot.lane.b32.xlu1 %v697_v6, %s862_s10  ;;  %743 = vrot.lane.b32.xlu0 %v702_v10, %s863_s11  ;;  %s793_s10 = scalar_lea.vmem %s792_s8, 768 }
  0x55   : > { %p795_p10 = scmp.lt.s32.totalorder %s793_s10, %s787_s6 }
  0x57   : > { %p796_p2 = por %p795_p10, %p794_p7 }
  0x58   : > { %305 = vrot.lane.b32.xlu1 %v1004_v1, %s867_s17  ;;  %303 = vrot.lane.b32.xlu0 %v1012_v4, %s867_s17 }
  0x59   : > { %p797_p4 = pnand %p796_p2, %p790_p13 }
  0x5c   : > { %307 = vrot.lane.b32.xlu1 %v210_v8, %s867_s17  ;;  %301 = vrot.lane.b32.xlu0 %v1002_v0, %s867_s17 }
  0x60   : > { %330 = vperm.xlu0 %752, %v327_v13  }
  0xae   : > { %v694_v14 = vpop.permute.xlu1 %693  ;;  %v684_v15 = vpop.permute.xlu0 %683 }
  0xaf   : > { %v686_v16 = vunpack.i.h.bf16 %v684_v15  ;;  %v685_v17 = vunpack.i.l.bf16 %v684_v15  ;;  %v696_v18 = vunpack.i.h.bf16 %v694_v14  ;;  %v695_v19 = vunpack.i.l.bf16 %v694_v14 }
  0xb1   : > { %v205_v22 = vsel %vm203_vm1, %v685_v17, %v686_v16  ;;  %v236_v28 = vsel %vm234_vm3, %v695_v19, %v696_v18 }
  0xb2   : > { %v699_v20 = vpop.permute.xlu1 %698  ;;  %v689_v21 = vpop.permute.xlu0 %688  ;;  %v315_v31 = vsel %vm313_vm4, %v1012_v4, %v205_v22 }
  0xb3   : > { %v701_v23 = vunpack.i.h.bf16 %v699_v20  ;;  %v700_v24 = vunpack.i.l.bf16 %v699_v20  ;;  %v691_v25 = vunpack.i.h.bf16 %v689_v21  ;;  %v690_v26 = vunpack.i.l.bf16 %v689_v21 }
  0xb5   : > { %v221_v27 = vsel %vm219_vm2, %v690_v26, %v691_v25  ;;  %v204_v33 = vsel %vm203_vm1, %v700_v24, %v685_v17  ;;  %v206_v34 = vsel %vm203_vm1, %v686_v16, %v701_v23 }
  0xb6   : > { %v709_v29 = vpop.permute.xlu1 %708  ;;  %v704_v30 = vpop.permute.xlu0 %703  ;;  %v318_v32 = vsel %vm313_vm4, %v221_v27, %v236_v28  ;;  %v314_v46 = vsel %vm313_vm4, %v1002_v0, %v204_v33  ;;  %v316_v48 = vsel %vm313_vm4, %v1004_v1, %v206_v34 }
  0xb7   : > { %v711_v35 = vunpack.i.h.bf16 %v709_v29  ;;  %v710_v36 = vunpack.i.l.bf16 %v709_v29  ;;  %v706_v37 = vunpack.i.h.bf16 %v704_v30  ;;  %v705_v38 = vunpack.i.l.bf16 %v704_v30 }
  0xb8   : > { %v608_v39 = vpack.c.bf16 %v318_v32, %v315_v31 }
  0xb9   : > { %v220_v40 = vsel %vm219_vm2, %v705_v38, %v690_v26  ;;  %v235_v41 = vsel %vm234_vm3, %v710_v36, %v695_v19  ;;  %v222_v42 = vsel %vm219_vm2, %v691_v25, %v706_v37  ;;  %v237_v43 = vsel %vm234_vm3, %v696_v18, %v711_v35 }
  0xba   : > { %609 = vmatprep.subr.bf16.mxu0 %v608_v39  ;;  %v719_v44 = vpop.permute.xlu1 %718  ;;  %v714_v45 = vpop.permute.xlu0 %713  ;;  %v317_v47 = vsel %vm313_vm4, %v220_v40, %v235_v41  ;;  %v319_v49 = vsel %vm313_vm4, %v222_v42, %v237_v43  ;;  %v326_v39 = vld [vmem:[%s1127_s1] sm:$0xff] }
  0xbb   : > { %v721_v50 = vunpack.i.h.bf16 %v719_v44  ;;  %v720_v51 = vunpack.i.l.bf16 %v719_v44  ;;  %v716_v52 = vunpack.i.h.bf16 %v714_v45  ;;  %v715_v53 = vunpack.i.l.bf16 %v714_v45 }
  0xbc   : > { %v610_v54 = vpack.c.bf16 %v317_v47, %v314_v46  ;;  %v617_v55 = vpack.c.bf16 %v319_v49, %v316_v48 }
  0xbd   : > { %v266_v56 = vsel %vm264_vm5, %v720_v51, %v721_v50  ;;  %v251_v57 = vsel %vm249_vm6, %v715_v53, %v716_v52 }
  0xbe   : > { %611 = vmatpush1.bf16.msra.mxu0 %v610_v54  ;;  %618 = vmatpush3.bf16.msra.mxu1 %v617_v55  ;;  %v729_v58 = vpop.permute.xlu1 %728  ;;  %v724_v59 = vpop.permute.xlu0 %723  ;;  %v321_v4 = vsel %vm313_vm4, %v251_v57, %v266_v56 }
  0xbf   : > { %v731_v60 = vunpack.i.h.bf16 %v729_v58  ;;  %v730_v61 = vunpack.i.l.bf16 %v729_v58  ;;  %v726_v62 = vunpack.i.h.bf16 %v724_v59  ;;  %v725_v63 = vunpack.i.l.bf16 %v724_v59  ;;  %619 = vmatprep.subr.bf16.mxu1 %v858_v9 }
  0xc1   : > { %v296_v0 = vsel %vm294_vm7, %v730_v61, %v731_v60  ;;  %v281_v1 = vsel %vm279_vm8, %v725_v63, %v726_v62 }
  0xc2   : > { %v739_v2 = vpop.permute.xlu1 %738  ;;  %v734_v3 = vpop.permute.xlu0 %733  ;;  %v324_v5 = vsel %vm313_vm4, %v281_v1, %v296_v0 }
  0xc3   : > { %v741_v6 = vunpack.i.h.bf16 %v739_v2  ;;  %v740_v7 = vunpack.i.l.bf16 %v739_v2  ;;  %v736_v8 = vunpack.i.h.bf16 %v734_v3  ;;  %v735_v10 = vunpack.i.l.bf16 %v734_v3 }
  0xc4   : > { %v612_v12 = vpack.c.bf16 %v324_v5, %v321_v4 }
  0xc5   : > { %v265_v13 = vsel %vm264_vm5, %v740_v7, %v720_v51  ;;  %v267_v14 = vsel %vm264_vm5, %v721_v50, %v741_v6  ;;  %v250_v9 = vsel %vm249_vm6, %v735_v10, %v715_v53  ;;  %v252_v15 = vsel %vm249_vm6, %v716_v52, %v736_v8 }
  0xc6   : > { %613 = vmatprep.subr.bf16.mxu0 %v612_v12  ;;  %v749_v16 = vpop.permute.xlu1 %748  ;;  %v744_v17 = vpop.permute.xlu0 %743  ;;  %v320_v28 = vsel %vm313_vm4, %v250_v9, %v265_v13  ;;  %v322_v30 = vsel %vm313_vm4, %v252_v15, %v267_v14 }
  0xc7   : > { %v751_v18 = vunpack.i.h.bf16 %v749_v16  ;;  %v750_v19 = vunpack.i.l.bf16 %v749_v16  ;;  %v746_v20 = vunpack.i.h.bf16 %v744_v17  ;;  %v745_v21 = vunpack.i.l.bf16 %v744_v17 }
  0xc9   : > { %v295_v22 = vsel %vm294_vm7, %v750_v19, %v730_v61  ;;  %v297_v23 = vsel %vm294_vm7, %v731_v60, %v751_v18  ;;  %v280_v24 = vsel %vm279_vm8, %v745_v21, %v725_v63  ;;  %v282_v25 = vsel %vm279_vm8, %v726_v62, %v746_v20 }
  0xca   : > { %v306_v26 = vpop.permute.xlu1 %305  ;;  %v304_v27 = vpop.permute.xlu0 %303  ;;  %v323_v29 = vsel %vm313_vm4, %v280_v24, %v295_v22  ;;  %v325_v31 = vsel %vm313_vm4, %v282_v25, %v297_v23 }
  0xcb   : > { %v311_v32 = vsel %vm309_vm9, %v304_v27, %v306_v26  ;;  %v614_v33 = vpack.c.bf16 %v323_v29, %v320_v28  ;;  %v620_v34 = vpack.c.bf16 %v325_v31, %v322_v30 }
  0xcd   : > { %615 = vmatpush1.bf16.msra.mxu0 %v614_v33  ;;  %621 = vmatpush3.bf16.msra.mxu1 %v620_v34 }
  0xce   : > { %v308_v35 = vpop.permute.xlu1 %307  ;;  %v302_v36 = vpop.permute.xlu0 %301  ;;  %580 = vmatprep.subr.msk.mxu0 %vm313_vm4, %v311_v32  ;;  %603 = vmatprep.subr.mxu1 %v864_v11 }
  0xcf   : > { %v312_v37 = vsel %vm309_vm9, %v306_v26, %v308_v35  ;;  %v310_v38 = vsel %vm309_vm9, %v302_v36, %v304_v27 }
  0xd1   : > { %581 = vmatpush1.msk.msra.mxu0 %vm313_vm4, %v310_v38  ;;  %604 = vmatpush3.msk.msra.mxu1 %vm313_vm4, %v312_v37 }
  0xd2   : > { %582 = vmatmul.mubr.msk.f32.vlgmr.msra.gmra.mrb[0].mxu0 %vm333_vm10, %v326_v39  ;;  %606 = vmatmul.mubr.msk.f32.vlgmr.msra.gmra.mrb[0].mxu1 %vm333_vm10, %v326_v39 }
  0xdf   : > { %v331_v40 = vpop.permute.xlu0 %330 }
 0x1a5   : > { %v409_v11 = vpop.f32.mrb[0].mxu0  ;;  %v480_v41 = vpop.f32.mrb[0].mxu1 }
 0x1a6   : > { %v410_v42 = vadd.f32 %v409_v11, %v331_v40  ;;  %v481_v43 = vadd.f32 %v480_v41, %v331_v40  ;;  %v411_v44 = vpop.f32.mrb[1].mxu0  ;;  %v607_v45 = vpop.f32.mrb[1].mxu1 }
 0x1a7   : > { %v412_v46 = vadd.f32 %v411_v44, %v331_v40 }
 0x1a8   : > { %484 = vst [vmem:[%s186_s30] sm:$0xff] %v410_v42  ;;  %486 = vst [vmem:[%s186_s30 + $0x10] sm:$0xff] %v481_v43 }
 0x1a9   : > { %485 = vst [vmem:[%s186_s30 + $0x8] sm:$0xff] %v412_v46 }
 0x1aa   : > { %800 = shalt.err (!%p797_p4)
}
 0x1ab   : > { %s801_s29 = scalar_lea.hbm %s1082_s23, 384  ;;  %s805_s19 = scalar_lea.hbm %s1129_s3, 768 }
 0x1ac   : > { %p802_p5 = scmp.ne.s32.totalorder %s1082_s23, %s801_s29  ;;  %p806_p0 = scmp.lt.u32.totalorder %s1082_s23, %s1129_s3 }
 0x1ad   : > { %p807_p1 = scmp.lt.u32.totalorder %s805_s19, %s801_s29  ;;  %p809_p6 = scmp.lt.u32.totalorder %s801_s29, %s1082_s23 }
 0x1ae   : > { %p803_p8 = pnand %p802_p5, %p1138_p11 }
 0x1af   : > { %p808_p3 = por %p807_p1, %p806_p0 }
 0x1b0   : > { %p804_p9 = pneg %p803_p8 }
 0x1b1   : > { %p810_p12 = por %p809_p6, %p808_p3 }
 0x1b3   : > { %p811_p13 = pnand %p810_p12, %p804_p9 }
 0x1b5   : > { %814 = shalt.err (!%p811_p13)
}
 0x1b6   : > { %626 = dma.vmem_to_hbm [thread:$0]  (%p1138_p11), %s1084_s5, 384, %s1082_s23, %s488_s16  }
 0x1b7 PF: > { %s514_s26 = sand.u32 1, %s841_s12   ;;  %p1139_p7 = scmp.ne.s32.totalorder %s1134_s25, 0 }
 0x1b8   : > { %p1140_p10 = scmp.ge.s32.totalorder %s853_s15, 2  ;;  %s515_s27 = scalar_lea.sflag [#allocation4], %s514_s26 }
 0x1ba   : > { %p633_p2 = pnand %p1140_p10, %p1139_p7 }
 0x1bc   : > { %836 = dma.done.wait (!%p633_p2), %s515_s27, 384  }
 0x1bd   : > { %838 = vsyncadd (!%p633_p2), %s515_s27, 4294966912  ;;  %p16_p4 = scmp.ge.s32.totalorder %s914_s18, 4   ;;  %s1141_s12 = smov %s845_s13 }
 0x1be   : > { %s1142_s13 = smov %s849_s14  ;;  %s1143_s14 = smov %s926_s21 }
 0x1bf   : > { %s1144_s15 = smov %s914_s18  ;;  %18 = sbr.rel (!%p16_p4) target bundleno = 5 (0x5), region = 77 }
 0x1c6   :  { %520 = vsyncpa [#allocation3], 1 }
 0x1c7   :  { %522 = vsyncpa [#allocation3 + $0x1], 1 }
 0x1c8   :  { %523 = vsyncpa [#allocation4], 1 }
 0x1c9   :  { %525 = vsyncpa [#allocation4 + $0x1], 1 }

</bundles_post_ra>
